<compile_context>
chip_gen: v7x
topology: tpu7x:2x2x1
jax: 0.10.0
libtpu: 0.0.40
codegen_flags: <defaults>
</compile_context>

<pallas_src>
import functools

import jax
import jax.numpy as jnp
from jax.experimental import pallas as pl
from jax.experimental.pallas import tpu as pltpu

LANE = 128                                   # lane width / padded feature dim
_VMEM = pl.BlockSpec(memory_space=pltpu.MemorySpace.VMEM)


def _round_up(x, m):
    return ((x + m - 1) // m) * m


def _pad_to(a, shape, value=0):
    return jnp.pad(a, [(0, t - s) for s, t in zip(a.shape, shape)],
                   constant_values=value)


# ---------------------------------------------------------------------------
# Fused single-call kernel (small / mid graphs: everything resident in VMEM)
# ---------------------------------------------------------------------------

def _fused_fwd_kernel(a_ref, x_ref, w1_ref, b1_ref, w2_ref, b2_ref,
                      batch_ref, wh_ref, bh_ref, o_ref, *, num_graphs_pad):
    # ---- layer 1: relu(A @ (X @ W1) + b1); bf16 MXU inputs, f32 accumulate.
    xw = jnp.dot(x_ref[...], w1_ref[...], preferred_element_type=jnp.float32)
    h = jnp.dot(a_ref[...], xw.astype(jnp.bfloat16),
                preferred_element_type=jnp.float32)
    h = jnp.maximum(h + b1_ref[...], 0.0)

    # ---- layer 2
    hw = jnp.dot(h.astype(jnp.bfloat16), w2_ref[...],
                 preferred_element_type=jnp.float32)
    h = jnp.dot(a_ref[...], hw.astype(jnp.bfloat16),
                preferred_element_type=jnp.float32)
    h = jnp.maximum(h + b2_ref[...], 0.0)

    # ---- global max pool: build all pooled rows in registers (no scratch
    # round-trip, no single-sublane stores), then one heads matmul against the
    # pre-concatenated [W_iou | W_iop].
    bids = batch_ref[...]                                    # (N, 1) int32
    rows = []
    for gi in range(num_graphs_pad):                         # static, small
        sel = bids == gi                                     # (N, 1) bool
        rows.append(jnp.max(jnp.where(sel, h, -jnp.inf), axis=0, keepdims=True))
    p = jnp.concatenate(rows, axis=0)                        # (G_pad, D)
    p = jnp.where(p == -jnp.inf, 0.0, p)                     # empty-graph guard
    o_ref[...] = (jnp.dot(p.astype(jnp.bfloat16), wh_ref[...],
                          preferred_element_type=jnp.float32) + bh_ref[...])


# ---------------------------------------------------------------------------
# Tiled kernels (large graphs)
# ---------------------------------------------------------------------------

def _layer_kernel(kmap_ref, kcnt_ref, a_ref, x_ref, w_ref, b_ref, o_ref,
                  acc_ref):
    """relu(A @ (X @ W) + b) with K tiled; XW fused; zero A tiles skipped."""
    i = pl.program_id(0)
    k = pl.program_id(1)

    @pl.when(k == 0)
    def _():
        acc_ref[...] = jnp.zeros_like(acc_ref)

    # Skip compute for all-zero A tiles (block-diagonal batched adjacency);
    # their DMA is also skipped because the index map repeats the last valid
    # block index for padded K steps.
    @pl.when(k < kcnt_ref[i])
    def _():
        xw = jnp.dot(x_ref[...], w_ref[...], preferred_element_type=jnp.float32)
        acc_ref[...] += jnp.dot(a_ref[...], xw.astype(jnp.bfloat16),
                                preferred_element_type=jnp.float32)

    @pl.when(k == pl.num_programs(1) - 1)
    def _():
        o_ref[...] = jnp.maximum(acc_ref[...] + b_ref[...],
                                 0.0).astype(o_ref.dtype)


def _pool_heads_kernel(h_ref, batch_ref, wh_ref, bh_ref, o_ref, pool_ref,
                       *, num_graphs_pad):
    """Running per-graph max over node tiles; heads matmul in the epilogue."""
    k = pl.program_id(0)

    @pl.when(k == 0)
    def _():
        pool_ref[...] = jnp.full_like(pool_ref, -jnp.inf)

    h = h_ref[...].astype(jnp.float32)                       # (tile, D)
    bids = batch_ref[...]                                    # (tile, 1) int32
    rows = []
    for gi in range(num_graphs_pad):                         # static, small
        sel = bids == gi
        rows.append(jnp.max(jnp.where(sel, h, -jnp.inf), axis=0, keepdims=True))
    # Single aligned (G_pad, D) block update -- no sublane-masked RMW loops.
    pool_ref[...] = jnp.maximum(pool_ref[...], jnp.concatenate(rows, axis=0))

    @pl.when(k == pl.num_programs(0) - 1)
    def _():
        p = pool_ref[...]
        p = jnp.where(p == -jnp.inf, 0.0, p)                 # empty-graph guard
        o_ref[...] = (jnp.dot(p.astype(jnp.bfloat16), wh_ref[...],
                              preferred_element_type=jnp.float32)
                      + bh_ref[...])


# ---------------------------------------------------------------------------
# Wrappers
# ---------------------------------------------------------------------------

def _prepare_weights(params, dp):
    """Zero-pad all feature dims to `dp` lanes, pre-concat heads, cast bf16."""
    din, h1 = params["w1"].shape
    h2 = params["w2"].shape[1]
    odim2 = params["w_iou"].shape[1] + params["w_iop"].shape[1]
    assert max(din, h1, h2, odim2) <= dp, "feature dims must fit one lane tile"

    w1 = _pad_to(params["w1"], (dp, dp)).astype(jnp.bfloat16)
    w2 = _pad_to(params["w2"], (dp, dp)).astype(jnp.bfloat16)
    b1 = _pad_to(params["b1"].reshape(1, -1), (1, dp)).astype(jnp.float32)
    b2 = _pad_to(params["b2"].reshape(1, -1), (1, dp)).astype(jnp.float32)
    w_cat = jnp.concatenate([params["w_iou"], params["w_iop"]], axis=1)
    b_cat = jnp.concatenate([params["b_iou"], params["b_iop"]], axis=0)
    wh = _pad_to(w_cat, (dp, dp)).astype(jnp.bfloat16)
    bh = _pad_to(b_cat.reshape(1, -1), (1, dp)).astype(jnp.float32)
    return w1, b1, w2, b2, wh, bh, odim2


def _pad_batch_ids(batch, n_pad):
    return _pad_to(batch.astype(jnp.int32).reshape(-1, 1), (n_pad, 1), value=-1)


def gcn_forward_fused(params, a_norm, x, batch, num_graphs):
    """Whole forward in ONE pallas_call (N up to fused_max_nodes)."""
    n = x.shape[0]
    dp = LANE
    n_pad = _round_up(n, 8)
    g_pad = _round_up(num_graphs, 8)

    w1, b1, w2, b2, wh, bh, odim2 = _prepare_weights(params, dp)
    a_p = _pad_to(a_norm, (n_pad, n_pad)).astype(jnp.bfloat16)
    x_p = _pad_to(x, (n_pad, dp)).astype(jnp.bfloat16)
    batch_p = _pad_batch_ids(batch, n_pad)

    flops = int(4 * n_pad * dp * dp + 4 * n_pad * n_pad * dp
                + 2 * g_pad * dp * dp)
    bytes_accessed = int(2 * (a_p.size + x_p.size + w1.size + w2.size + wh.size)
                         + 4 * (b1.size + b2.size + bh.size + g_pad * dp)
                         + 4 * batch_p.size)

    kernel = functools.partial(_fused_fwd_kernel, num_graphs_pad=g_pad)
    out = pl.pallas_call(
        kernel,
        out_shape=jax.ShapeDtypeStruct((g_pad, dp), jnp.float32),
        in_specs=[_VMEM] * 9,
        out_specs=_VMEM,
        compiler_params=pltpu.CompilerParams(
            vmem_limit_bytes=48 * 1024 * 1024),   # > defaults, < v7x 64 MiB phys
        cost_estimate=pl.CostEstimate(flops=flops, transcendentals=0,
                                      bytes_accessed=bytes_accessed),
    )(a_p, x_p, w1, b1, w2, b2, batch_p, wh, bh)
    return out[:num_graphs, :odim2]


def _pick_tile(n, max_tile=512):
    """Largest tile <= max_tile with >=2 row tiles (feed both v7x TCs)."""
    if n >= 2 * 512 and max_tile >= 512:
        return 512, _round_up(n, 512)
    if n >= 2 * 256 and max_tile >= 256:
        return 256, _round_up(n, 256)
    return 128, _round_up(n, 128)


def _build_tile_skip_maps(a_p, tile):
    """Per row-tile list of nonzero K tiles (padded K steps repeat the last)."""
    n_pad = a_p.shape[0]
    nt = n_pad // tile
    blocks = a_p.reshape(nt, tile, nt, tile)
    nz = jnp.any(blocks != 0, axis=(1, 3))                    # (nt, nt) bool
    counts = jnp.sum(nz, axis=1).astype(jnp.int32)            # (nt,)
    order = jnp.argsort(jnp.logical_not(nz), axis=1,
                        stable=True).astype(jnp.int32)        # nonzero k first
    col = jnp.arange(nt, dtype=jnp.int32)[None, :]
    last = jnp.take_along_axis(order, jnp.maximum(counts - 1, 0)[:, None],
                               axis=1)
    kmap = jnp.where(col < counts[:, None], order, last).astype(jnp.int32)
    return kmap, counts


def _gcn_layer_tiled(a_p, x_p, w_p, b_p, kmap, kcnt, *, tile):
    n_pad = a_p.shape[0]
    dp = w_p.shape[1]
    nt = n_pad // tile

    flops = int(2 * n_pad * n_pad * dp + 2 * n_pad * dp * dp * nt)
    bytes_accessed = int(2 * (a_p.size + nt * x_p.size + n_pad * dp)
                         + 2 * w_p.size + 4 * b_p.size)

    grid_spec = pltpu.PrefetchScalarGridSpec(
        num_scalar_prefetch=2,
        grid=(nt, nt),
        in_specs=[
            pl.BlockSpec((tile, tile), lambda i, k, km, kc: (i, km[i, k])),
            pl.BlockSpec((tile, dp), lambda i, k, km, kc: (km[i, k], 0)),
            pl.BlockSpec((dp, dp), lambda i, k, km, kc: (0, 0)),
            pl.BlockSpec((1, dp), lambda i, k, km, kc: (0, 0)),
        ],
        out_specs=pl.BlockSpec((tile, dp), lambda i, k, km, kc: (i, 0)),
        scratch_shapes=[pltpu.VMEM((tile, dp), jnp.float32)],
    )
    return pl.pallas_call(
        _layer_kernel,
        out_shape=jax.ShapeDtypeStruct((n_pad, dp), jnp.bfloat16),
        grid_spec=grid_spec,
        compiler_params=pltpu.CompilerParams(
            dimension_semantics=("parallel", "arbitrary")),
        cost_estimate=pl.CostEstimate(flops=flops, transcendentals=0,
                                      bytes_accessed=bytes_accessed),
    )(kmap, kcnt, a_p, x_p, w_p, b_p)


def _global_pool_heads_tiled(h_p, batch_p, wh, bh, *, tile, num_graphs_pad):
    n_pad, dp = h_p.shape
    kernel = functools.partial(_pool_heads_kernel,
                               num_graphs_pad=num_graphs_pad)
    return pl.pallas_call(
        kernel,
        out_shape=jax.ShapeDtypeStruct((num_graphs_pad, dp), jnp.float32),
        grid=(n_pad // tile,),
        in_specs=[pl.BlockSpec((tile, dp), lambda k: (k, 0)),
                  pl.BlockSpec((tile, 1), lambda k: (k, 0)),
                  pl.BlockSpec((dp, dp), lambda k: (0, 0)),
                  pl.BlockSpec((1, dp), lambda k: (0, 0))],
        out_specs=pl.BlockSpec((num_graphs_pad, dp), lambda k: (0, 0)),
        scratch_shapes=[pltpu.VMEM((num_graphs_pad, dp), jnp.float32)],
        compiler_params=pltpu.CompilerParams(
            dimension_semantics=("arbitrary",)),
    )(h_p, batch_p, wh, bh)


def gcn_forward_tiled(params, a_norm, x, batch, num_graphs, *, max_tile=512):
    """Grid/BlockSpec tiled path for graphs above the fused-VMEM threshold."""
    n = x.shape[0]
    dp = LANE
    tile, n_pad = _pick_tile(n, max_tile)
    g_pad = _round_up(num_graphs, 8)

    w1, b1, w2, b2, wh, bh, odim2 = _prepare_weights(params, dp)
    a_p = _pad_to(a_norm, (n_pad, n_pad)).astype(jnp.bfloat16)
    x_p = _pad_to(x, (n_pad, dp)).astype(jnp.bfloat16)
    batch_p = _pad_batch_ids(batch, n_pad)

    kmap, kcnt = _build_tile_skip_maps(a_p, tile)

    h = _gcn_layer_tiled(a_p, x_p, w1, b1, kmap, kcnt, tile=tile)
    h = _gcn_layer_tiled(a_p, h, w2, b2, kmap, kcnt, tile=tile)
    out = _global_pool_heads_tiled(h, batch_p, wh, bh,
                                   tile=tile, num_graphs_pad=g_pad)
    return out[:num_graphs, :odim2]


# ---------------------------------------------------------------------------
# Plain-JAX glue: dense normalized adjacency (scatter-add of edge_index has no
# clean Pallas equivalent; done host/XLA-side).
# ---------------------------------------------------------------------------

def build_norm_adj(edge_index, num_nodes):
    src, dst = edge_index[0], edge_index[1]
    a = jnp.zeros((num_nodes, num_nodes), jnp.float32)
    a = a.at[dst, src].add(1.0)                         # message src -> dst
    a = a + jnp.eye(num_nodes, dtype=jnp.float32)       # add_self_loops
    deg = jnp.sum(a, axis=1)
    dinv = jnp.where(deg > 0, 1.0 / jnp.sqrt(deg), 0.0)
    return dinv[:, None] * a * dinv[None, :]


def gcn_forward(params, x, edge_index, batch, num_graphs,
                *, fused_max_nodes=2048, max_tile=512):
    # fused_max_nodes=2048 keeps the resident A (bf16, 8 MiB) + intermediates
    # well under the 48 MiB VMEM limit on every generation (v7x phys 64 MiB);
    # v5e/v6e (128 MiB phys) could safely raise it to ~4096.
    n = x.shape[0]
    a_norm = build_norm_adj(edge_index, n)
    if n <= fused_max_nodes:
        return gcn_forward_fused(params, a_norm, x, batch, num_graphs)
    return gcn_forward_tiled(params, a_norm, x, batch, num_graphs,
                             max_tile=max_tile)


def gcn_forward_ref(params, x, edge_index, batch, num_graphs):
    """Pure-JAX f32 reference for correctness checking."""
    a = build_norm_adj(edge_index, x.shape[0])
    mask = batch[None, :] == jnp.arange(num_graphs)[:, None]
    h = jax.nn.relu(a @ (x @ params["w1"]) + params["b1"])
    h = jax.nn.relu(a @ (h @ params["w2"]) + params["b2"])
    p = jnp.max(jnp.where(mask[:, :, None], h[None, :, :], -jnp.inf), axis=1)
    p = jnp.where(jnp.isfinite(p), p, 0.0)
    iou = p @ params["w_iou"] + params["b_iou"]
    iop = p @ params["w_iop"] + params["b_iop"]
    return jnp.concatenate([iou, iop], axis=1)


# ---------------------------------------------------------------------------
# Deterministic parameter init (glorot-ish conv weights, uniform fc weights)
# ---------------------------------------------------------------------------

def init_params(key, input_dim, hidden1, hidden2, output_dim):
    ks = jax.random.split(key, 4)

    def glorot(k, fan_in, fan_out):
        lim = jnp.sqrt(6.0 / (fan_in + fan_out))
        return jax.random.uniform(k, (fan_in, fan_out), jnp.float32, -lim, lim)

    def linear(kw, fan_in, fan_out):
        lim = 1.0 / jnp.sqrt(fan_in)
        w = jax.random.uniform(kw, (fan_in, fan_out), jnp.float32, -lim, lim)
        return w, jnp.zeros((fan_out,), jnp.float32)

    w_iou, b_iou = linear(ks[2], hidden2, output_dim)
    w_iop, b_iop = linear(ks[3], hidden2, output_dim)
    return {
        "w1": glorot(ks[0], input_dim, hidden1),
        "b1": jnp.zeros((hidden1,), jnp.float32),
        "w2": glorot(ks[1], hidden1, hidden2),
        "b2": jnp.zeros((hidden2,), jnp.float32),
        "w_iou": w_iou, "b_iou": b_iou,
        "w_iop": w_iop, "b_iop": b_iop,
    }


def ring_edge_index(num_graphs, nodes_per_graph):
    edges = []
    for g in range(num_graphs):
        base = g * nodes_per_graph
        for i in range(nodes_per_graph):
            s, d = base + i, base + (i + 1) % nodes_per_graph
            edges.append((s, d))
            edges.append((d, s))
    return jnp.asarray(edges, dtype=jnp.int32).T            # (2, E)


# ---------------------------------------------------------------------------
# Demo
# ---------------------------------------------------------------------------

if __name__ == "__main__":
    INPUT_DIM, HIDDEN1, HIDDEN2, OUTPUT_DIM = 8, 32, 32, 4

    key = jax.random.PRNGKey(0)
    kx1, kx2, kp = jax.random.split(key, 3)
    params = init_params(kp, INPUT_DIM, HIDDEN1, HIDDEN2, OUTPUT_DIM)

    # ---- small batch: 2 ring graphs of 8 nodes -> fused single-kernel path.
    n1, g1, per1 = 16, 2, 8
    x1 = jax.random.normal(kx1, (n1, INPUT_DIM), jnp.float32)
    ei1 = ring_edge_index(g1, per1)
    batch1 = jnp.repeat(jnp.arange(g1, dtype=jnp.int32), per1)

    out1 = jax.block_until_ready(gcn_forward(params, x1, ei1, batch1, g1))
    ref1 = gcn_forward_ref(params, x1, ei1, batch1, g1)
    assert out1.shape == (g1, 2 * OUTPUT_DIM), out1.shape
    assert jnp.allclose(out1, ref1, atol=5e-2, rtol=5e-2)

    # ---- medium batch: 2 ring graphs of 128 nodes.  Force the tiled path
    # (fused_max_nodes=128) so the grid + zero-tile-skip kernels are covered.
    n2, g2, per2 = 256, 2, 128
    x2 = jax.random.normal(kx2, (n2, INPUT_DIM), jnp.float32)
    ei2 = ring_edge_index(g2, per2)
    batch2 = jnp.repeat(jnp.arange(g2, dtype=jnp.int32), per2)

    out2 = jax.block_until_ready(
        gcn_forward(params, x2, ei2, batch2, g2, fused_max_nodes=128))
    ref2 = gcn_forward_ref(params, x2, ei2, batch2, g2)
    assert out2.shape == (g2, 2 * OUTPUT_DIM), out2.shape
    assert jnp.allclose(out2, ref2, atol=5e-2, rtol=5e-2)

    # Default routing for the same medium batch uses the single fused launch.
    out2f = jax.block_until_ready(gcn_forward(params, x2, ei2, batch2, g2))
    assert jnp.allclose(out2f, ref2, atol=5e-2, rtol=5e-2)

    print("KERNEL_OK")
</pallas_src>

<mosaic_0001>
module attributes {stable_mosaic.version = 11 : i64} {
  func.func @_fused_fwd_kernel(%arg0: memref<16x16xbf16, #tpu.memory_space<vmem>>, %arg1: memref<16x128xbf16, #tpu.memory_space<vmem>>, %arg2: memref<128x128xbf16, #tpu.memory_space<vmem>>, %arg3: memref<1x128xf32, #tpu.memory_space<vmem>>, %arg4: memref<128x128xbf16, #tpu.memory_space<vmem>>, %arg5: memref<1x128xf32, #tpu.memory_space<vmem>>, %arg6: memref<16x1xi32, #tpu.memory_space<vmem>>, %arg7: memref<128x128xbf16, #tpu.memory_space<vmem>>, %arg8: memref<1x128xf32, #tpu.memory_space<vmem>>, %arg9: memref<8x128xf32, #tpu.memory_space<vmem>>) attributes {dimension_semantics = [], scalar_prefetch = 0 : i64, scratch_operands = 0 : i64, tpu.core_type = #tpu.core_type<tc>} {
    %c0 = arith.constant 0 : index
    %c0_0 = arith.constant 0 : index
    %0 = vector.load %arg1[%c0, %c0_0] : memref<16x128xbf16, #tpu.memory_space<vmem>>, vector<16x128xbf16>
    %c0_1 = arith.constant 0 : index
    %c0_2 = arith.constant 0 : index
    %1 = vector.load %arg2[%c0_1, %c0_2] : memref<128x128xbf16, #tpu.memory_space<vmem>>, vector<128x128xbf16>
    %cst = arith.constant dense<0.000000e+00> : vector<16x128xf32>
    %2 = tpu.matmul %0, %1, %cst {dimension_numbers = #tpu.dot_dimension_numbers<[1], [0], [0], [1], [0, 0, 1, 1], [], []>} : vector<16x128xbf16>, vector<128x128xbf16>, vector<16x128xf32> -> vector<16x128xf32>
    %c0_3 = arith.constant 0 : index
    %c0_4 = arith.constant 0 : index
    %3 = vector.load %arg0[%c0_3, %c0_4] : memref<16x16xbf16, #tpu.memory_space<vmem>>, vector<16x16xbf16>
    %4 = arith.truncf %2 : vector<16x128xf32> to vector<16x128xbf16>
    %cst_5 = arith.constant dense<0.000000e+00> : vector<16x128xf32>
    %5 = tpu.matmul %3, %4, %cst_5 {dimension_numbers = #tpu.dot_dimension_numbers<[1], [0], [0], [1], [0, 0, 1, 1], [], []>} : vector<16x16xbf16>, vector<16x128xbf16>, vector<16x128xf32> -> vector<16x128xf32>
    %c0_6 = arith.constant 0 : index
    %c0_7 = arith.constant 0 : index
    %6 = vector.load %arg3[%c0_6, %c0_7] : memref<1x128xf32, #tpu.memory_space<vmem>>, vector<1x128xf32>
    %7 = vector.broadcast %6 : vector<1x128xf32> to vector<16x128xf32>
    %8 = arith.addf %5, %7 : vector<16x128xf32>
    %cst_8 = arith.constant 0.000000e+00 : f32
    %9 = vector.broadcast %cst_8 : f32 to vector<16x128xf32>
    %10 = arith.maximumf %8, %9 : vector<16x128xf32>
    %11 = arith.truncf %10 : vector<16x128xf32> to vector<16x128xbf16>
    %c0_9 = arith.constant 0 : index
    %c0_10 = arith.constant 0 : index
    %12 = vector.load %arg4[%c0_9, %c0_10] : memref<128x128xbf16, #tpu.memory_space<vmem>>, vector<128x128xbf16>
    %cst_11 = arith.constant dense<0.000000e+00> : vector<16x128xf32>
    %13 = tpu.matmul %11, %12, %cst_11 {dimension_numbers = #tpu.dot_dimension_numbers<[1], [0], [0], [1], [0, 0, 1, 1], [], []>} : vector<16x128xbf16>, vector<128x128xbf16>, vector<16x128xf32> -> vector<16x128xf32>
    %c0_12 = arith.constant 0 : index
    %c0_13 = arith.constant 0 : index
    %14 = vector.load %arg0[%c0_12, %c0_13] : memref<16x16xbf16, #tpu.memory_space<vmem>>, vector<16x16xbf16>
    %15 = arith.truncf %13 : vector<16x128xf32> to vector<16x128xbf16>
    %cst_14 = arith.constant dense<0.000000e+00> : vector<16x128xf32>
    %16 = tpu.matmul %14, %15, %cst_14 {dimension_numbers = #tpu.dot_dimension_numbers<[1], [0], [0], [1], [0, 0, 1, 1], [], []>} : vector<16x16xbf16>, vector<16x128xbf16>, vector<16x128xf32> -> vector<16x128xf32>
    %c0_15 = arith.constant 0 : index
    %c0_16 = arith.constant 0 : index
    %17 = vector.load %arg5[%c0_15, %c0_16] : memref<1x128xf32, #tpu.memory_space<vmem>>, vector<1x128xf32>
    %18 = vector.broadcast %17 : vector<1x128xf32> to vector<16x128xf32>
    %19 = arith.addf %16, %18 : vector<16x128xf32>
    %cst_17 = arith.constant 0.000000e+00 : f32
    %20 = vector.broadcast %cst_17 : f32 to vector<16x128xf32>
    %21 = arith.maximumf %19, %20 : vector<16x128xf32>
    %c0_18 = arith.constant 0 : index
    %c0_19 = arith.constant 0 : index
    %22 = vector.load %arg6[%c0_18, %c0_19] : memref<16x1xi32, #tpu.memory_space<vmem>>, vector<16x1xi32>
    %c0_i32 = arith.constant 0 : i32
    %23 = vector.broadcast %c0_i32 : i32 to vector<16x1xi32>
    %24 = arith.cmpi eq, %22, %23 : vector<16x1xi32>
    %cst_20 = arith.constant 0xFF800000 : f32
    %25 = vector.shape_cast %24 : vector<16x1xi1> to vector<16x1xi1>
    %26 = vector.broadcast %25 : vector<16x1xi1> to vector<16x128xi1>
    %27 = vector.broadcast %cst_20 : f32 to vector<16x128xf32>
    %28 = arith.select %26, %21, %27 : vector<16x128xi1>, vector<16x128xf32>
    %cst_21 = arith.constant dense<0xFF800000> : vector<128xf32>
    %29 = vector.multi_reduction <maximumf>, %28, %cst_21 [0] : vector<16x128xf32> to vector<128xf32>
    %30 = vector.shape_cast %29 : vector<128xf32> to vector<1x128xf32>
    %c1_i32 = arith.constant 1 : i32
    %31 = vector.broadcast %c1_i32 : i32 to vector<16x1xi32>
    %32 = arith.cmpi eq, %22, %31 : vector<16x1xi32>
    %cst_22 = arith.constant 0xFF800000 : f32
    %33 = vector.shape_cast %32 : vector<16x1xi1> to vector<16x1xi1>
    %34 = vector.broadcast %33 : vector<16x1xi1> to vector<16x128xi1>
    %35 = vector.broadcast %cst_22 : f32 to vector<16x128xf32>
    %36 = arith.select %34, %21, %35 : vector<16x128xi1>, vector<16x128xf32>
    %cst_23 = arith.constant dense<0xFF800000> : vector<128xf32>
    %37 = vector.multi_reduction <maximumf>, %36, %cst_23 [0] : vector<16x128xf32> to vector<128xf32>
    %38 = vector.shape_cast %37 : vector<128xf32> to vector<1x128xf32>
    %c2_i32 = arith.constant 2 : i32
    %39 = vector.broadcast %c2_i32 : i32 to vector<16x1xi32>
    %40 = arith.cmpi eq, %22, %39 : vector<16x1xi32>
    %cst_24 = arith.constant 0xFF800000 : f32
    %41 = vector.shape_cast %40 : vector<16x1xi1> to vector<16x1xi1>
    %42 = vector.broadcast %41 : vector<16x1xi1> to vector<16x128xi1>
    %43 = vector.broadcast %cst_24 : f32 to vector<16x128xf32>
    %44 = arith.select %42, %21, %43 : vector<16x128xi1>, vector<16x128xf32>
    %cst_25 = arith.constant dense<0xFF800000> : vector<128xf32>
    %45 = vector.multi_reduction <maximumf>, %44, %cst_25 [0] : vector<16x128xf32> to vector<128xf32>
    %46 = vector.shape_cast %45 : vector<128xf32> to vector<1x128xf32>
    %c3_i32 = arith.constant 3 : i32
    %47 = vector.broadcast %c3_i32 : i32 to vector<16x1xi32>
    %48 = arith.cmpi eq, %22, %47 : vector<16x1xi32>
    %cst_26 = arith.constant 0xFF800000 : f32
    %49 = vector.shape_cast %48 : vector<16x1xi1> to vector<16x1xi1>
    %50 = vector.broadcast %49 : vector<16x1xi1> to vector<16x128xi1>
    %51 = vector.broadcast %cst_26 : f32 to vector<16x128xf32>
    %52 = arith.select %50, %21, %51 : vector<16x128xi1>, vector<16x128xf32>
    %cst_27 = arith.constant dense<0xFF800000> : vector<128xf32>
    %53 = vector.multi_reduction <maximumf>, %52, %cst_27 [0] : vector<16x128xf32> to vector<128xf32>
    %54 = vector.shape_cast %53 : vector<128xf32> to vector<1x128xf32>
    %c4_i32 = arith.constant 4 : i32
    %55 = vector.broadcast %c4_i32 : i32 to vector<16x1xi32>
    %56 = arith.cmpi eq, %22, %55 : vector<16x1xi32>
    %cst_28 = arith.constant 0xFF800000 : f32
    %57 = vector.shape_cast %56 : vector<16x1xi1> to vector<16x1xi1>
    %58 = vector.broadcast %57 : vector<16x1xi1> to vector<16x128xi1>
    %59 = vector.broadcast %cst_28 : f32 to vector<16x128xf32>
    %60 = arith.select %58, %21, %59 : vector<16x128xi1>, vector<16x128xf32>
    %cst_29 = arith.constant dense<0xFF800000> : vector<128xf32>
    %61 = vector.multi_reduction <maximumf>, %60, %cst_29 [0] : vector<16x128xf32> to vector<128xf32>
    %62 = vector.shape_cast %61 : vector<128xf32> to vector<1x128xf32>
    %c5_i32 = arith.constant 5 : i32
    %63 = vector.broadcast %c5_i32 : i32 to vector<16x1xi32>
    %64 = arith.cmpi eq, %22, %63 : vector<16x1xi32>
    %cst_30 = arith.constant 0xFF800000 : f32
    %65 = vector.shape_cast %64 : vector<16x1xi1> to vector<16x1xi1>
    %66 = vector.broadcast %65 : vector<16x1xi1> to vector<16x128xi1>
    %67 = vector.broadcast %cst_30 : f32 to vector<16x128xf32>
    %68 = arith.select %66, %21, %67 : vector<16x128xi1>, vector<16x128xf32>
    %cst_31 = arith.constant dense<0xFF800000> : vector<128xf32>
    %69 = vector.multi_reduction <maximumf>, %68, %cst_31 [0] : vector<16x128xf32> to vector<128xf32>
    %70 = vector.shape_cast %69 : vector<128xf32> to vector<1x128xf32>
    %c6_i32 = arith.constant 6 : i32
    %71 = vector.broadcast %c6_i32 : i32 to vector<16x1xi32>
    %72 = arith.cmpi eq, %22, %71 : vector<16x1xi32>
    %cst_32 = arith.constant 0xFF800000 : f32
    %73 = vector.shape_cast %72 : vector<16x1xi1> to vector<16x1xi1>
    %74 = vector.broadcast %73 : vector<16x1xi1> to vector<16x128xi1>
    %75 = vector.broadcast %cst_32 : f32 to vector<16x128xf32>
    %76 = arith.select %74, %21, %75 : vector<16x128xi1>, vector<16x128xf32>
    %cst_33 = arith.constant dense<0xFF800000> : vector<128xf32>
    %77 = vector.multi_reduction <maximumf>, %76, %cst_33 [0] : vector<16x128xf32> to vector<128xf32>
    %78 = vector.shape_cast %77 : vector<128xf32> to vector<1x128xf32>
    %c7_i32 = arith.constant 7 : i32
    %79 = vector.broadcast %c7_i32 : i32 to vector<16x1xi32>
    %80 = arith.cmpi eq, %22, %79 : vector<16x1xi32>
    %cst_34 = arith.constant 0xFF800000 : f32
    %81 = vector.shape_cast %80 : vector<16x1xi1> to vector<16x1xi1>
    %82 = vector.broadcast %81 : vector<16x1xi1> to vector<16x128xi1>
    %83 = vector.broadcast %cst_34 : f32 to vector<16x128xf32>
    %84 = arith.select %82, %21, %83 : vector<16x128xi1>, vector<16x128xf32>
    %cst_35 = arith.constant dense<0xFF800000> : vector<128xf32>
    %85 = vector.multi_reduction <maximumf>, %84, %cst_35 [0] : vector<16x128xf32> to vector<128xf32>
    %86 = vector.shape_cast %85 : vector<128xf32> to vector<1x128xf32>
    %87 = tpu.concatenate %30, %38, %46, %54, %62, %70, %78, %86 in 0 : vector<1x128xf32>, vector<1x128xf32>, vector<1x128xf32>, vector<1x128xf32>, vector<1x128xf32>, vector<1x128xf32>, vector<1x128xf32>, vector<1x128xf32> -> vector<8x128xf32>
    %cst_36 = arith.constant 0xFF800000 : f32
    %88 = vector.broadcast %cst_36 : f32 to vector<8x128xf32>
    %89 = arith.cmpf oeq, %87, %88 : vector<8x128xf32>
    %cst_37 = arith.constant 0.000000e+00 : f32
    %90 = vector.broadcast %cst_37 : f32 to vector<8x128xf32>
    %91 = arith.select %89, %90, %87 : vector<8x128xi1>, vector<8x128xf32>
    %92 = arith.truncf %91 : vector<8x128xf32> to vector<8x128xbf16>
    %c0_38 = arith.constant 0 : index
    %c0_39 = arith.constant 0 : index
    %93 = vector.load %arg7[%c0_38, %c0_39] : memref<128x128xbf16, #tpu.memory_space<vmem>>, vector<128x128xbf16>
    %cst_40 = arith.constant dense<0.000000e+00> : vector<8x128xf32>
    %94 = tpu.matmul %92, %93, %cst_40 {dimension_numbers = #tpu.dot_dimension_numbers<[1], [0], [0], [1], [0, 0, 1, 1], [], []>} : vector<8x128xbf16>, vector<128x128xbf16>, vector<8x128xf32> -> vector<8x128xf32>
    %c0_41 = arith.constant 0 : index
    %c0_42 = arith.constant 0 : index
    %95 = vector.load %arg8[%c0_41, %c0_42] : memref<1x128xf32, #tpu.memory_space<vmem>>, vector<1x128xf32>
    %96 = vector.broadcast %95 : vector<1x128xf32> to vector<8x128xf32>
    %97 = arith.addf %94, %96 : vector<8x128xf32>
    %c0_43 = arith.constant 0 : index
    %c0_44 = arith.constant 0 : index
    %98 = vector.load %arg9[%c0_43, %c0_44] : memref<8x128xf32, #tpu.memory_space<vmem>>, vector<8x128xf32>
    tpu.vector_store %arg9[%c0_43, %c0_44], %97 {strides = array<i32>} : memref<8x128xf32, #tpu.memory_space<vmem>>, vector<8x128xf32>,
    return
  }
}

</mosaic_0001>

<bundles_post_ra>
// kernel: tpu_custom_call.1
= control target key start
LH: loop header
LB: loop body
LE: loop exit
PB: predicated region body
PF: predicated region fallthrough
CT: control target
= control target key end

     0   :  { %14 = vsyncpa [#allocation3], 0  ;;  %s1193_s0 = inlined_call_operand.vmem [shape: bf16[16,16], index: 0, kind: input, shape index: {}]   ;;  %s1194_s1 = inlined_call_operand.vmem [shape: bf16[16,128], index: 1, kind: input, shape index: {}]   ;;  %s1195_s2 = inlined_call_operand.hbm [shape: bf16[128,128], index: 2, kind: input, shape index: {}]   ;;  %s1196_s3 = inlined_call_operand.vmem [shape: f32[1,128], index: 3, kind: input, shape index: {}]   ;;  %s1197_s4 = inlined_call_operand.hbm [shape: bf16[128,128], index: 4, kind: input, shape index: {}]   ;;  %s1198_s5 = inlined_call_operand.vmem [shape: f32[1,128], index: 5, kind: input, shape index: {}]   ;;  %s1199_s6 = inlined_call_operand.vmem [shape: s32[16,1], index: 6, kind: input, shape index: {}]   ;;  %s1200_s7 = inlined_call_operand.hbm [shape: bf16[128,128], index: 7, kind: input, shape index: {}]   ;;  %s1201_s8 = inlined_call_operand.vmem [shape: f32[1,128], index: 8, kind: input, shape index: {}]   ;;  %s1202_s9 = inlined_call_operand.hbm [shape: f32[8,128], index: 9, kind: output, shape index: {}]  }
   0x1   :  { %15 = vsyncpa [#allocation6], 0 }
   0x2   :  { %16 = vsyncpa [#allocation4], 0  ;;  %s992_s30 = smov [#allocation5]   ;;  %s993_s11 = smov [#allocation2]  }
   0x3   :  { %s40_s10 = sshll.u32 %s992_s30, 4  ;;  %s26_s12 = sshll.u32 %s993_s11, 4  ;;  %s41_s10 = int_to_ptr.vmem [resolvable:$true] %s40_s10  ;;  %s1051_s12 = int_to_ptr.vmem [resolvable:$true] %s26_s12 }
   0x4   :  { %s898_s15 = scalar_lea.hbm %s1197_s4, 1024 }
   0x5   :  { %p899_p0 = scmp.ne.s32.totalorder %s1197_s4, %s898_s15  ;;  %p902_p1 = scmp.lt.u32.totalorder %s898_s15, %s1197_s4 }
   0x7   :  { %p904_p2 = pnand %p902_p1, %p899_p0 }
   0x9   :  { %907 = shalt.err (!%p904_p2)
}
   0xa   :  { %s908_s20 = scalar_lea.vmem %s41_s10, 1024  ;;  %p913_p4 = scmp.lt.s32.totalorder %s41_s10, %s41_s10 }
   0xb   :  { %p909_p3 = scmp.ne.s32.totalorder %s41_s10, %s908_s20  ;;  %p914_p5 = scmp.lt.s32.totalorder %s908_s20, %s908_s20 }
   0xd   :  { %p915_p6 = por %p914_p5, %p913_p4 }
   0xf   :  { %p916_p7 = pnand %p915_p6, %p909_p3 }
  0x11   :  { %919 = shalt.err (!%p916_p7)
}
  0x12   :  { %s994_s21 = smov 64   ;;  %s995_s22 = smov 4  }
  0x13   :  { %46 = dma.hbm_to_vmem [thread:$0]  %s1197_s4, 1024, %s41_s10, [#allocation6], %s994_s21, %s994_s21, %s995_s22  }
  0x14   :  { %s920_s27 = scalar_lea.hbm %s1195_s2, 1024 }
  0x15   :  { %p921_p8 = scmp.ne.s32.totalorder %s1195_s2, %s920_s27  ;;  %p924_p9 = scmp.lt.u32.totalorder %s920_s27, %s1195_s2 }
  0x17   :  { %p926_p10 = pnand %p924_p9, %p921_p8 }
  0x19   :  { %929 = shalt.err (!%p926_p10)
}
  0x1a   :  { %s930_s13 = scalar_lea.vmem %s1051_s12, 1024  ;;  %p935_p12 = scmp.lt.s32.totalorder %s1051_s12, %s1051_s12 }
  0x1b   :  { %p931_p11 = scmp.ne.s32.totalorder %s1051_s12, %s930_s13  ;;  %p936_p13 = scmp.lt.s32.totalorder %s930_s13, %s930_s13 }
  0x1d   :  { %p937_p0 = por %p936_p13, %p935_p12 }
  0x1f   :  { %p938_p1 = pnand %p937_p0, %p931_p11 }
  0x21   :  { %941 = shalt.err (!%p938_p1)
}
  0x22   :  { %32 = dma.hbm_to_vmem [thread:$0]  %s1195_s2, 1024, %s1051_s12, [#allocation3], %s994_s21, %s994_s21, %s995_s22  }
  0x23   :  { %s996_s14 = smov [#allocation7]   ;;  %s942_s18 = scalar_lea.hbm %s1200_s7, 1024 }
  0x24   :  { %s56_s15 = sshll.u32 %s996_s14, 4  ;;  %p943_p2 = scmp.ne.s32.totalorder %s1200_s7, %s942_s18  ;;  %s57_s15 = int_to_ptr.vmem [resolvable:$true] %s56_s15 }
  0x25   :  { %p946_p3 = scmp.lt.u32.totalorder %s942_s18, %s1200_s7 }
  0x27   :  { %p948_p4 = pnand %p946_p3, %p943_p2 }
  0x29   :  { %951 = shalt.err (!%p948_p4)
}
  0x2a   :  { %s952_s25 = scalar_lea.vmem %s57_s15, 1024  ;;  %p957_p6 = scmp.lt.s32.totalorder %s57_s15, %s57_s15 }
  0x2b   :  { %p953_p5 = scmp.ne.s32.totalorder %s57_s15, %s952_s25  ;;  %p958_p7 = scmp.lt.s32.totalorder %s952_s25, %s952_s25 }
  0x2d   :  { %p959_p8 = por %p958_p7, %p957_p6 }
  0x2f   :  { %p960_p9 = pnand %p959_p8, %p953_p5 }
  0x31   :  { %963 = shalt.err (!%p960_p9)
}
  0x32   :  { %62 = dma.hbm_to_vmem [thread:$0]  %s1200_s7, 1024, %s57_s15, [#allocation6], %s994_s21, %s994_s21, %s995_s22  }
  0x33   :  { %986 = dma.done.wait [#allocation3], 1024  }
  0x34   :  { %987 = vsyncadd [#allocation3], 4294966272 }
  0x35   :  { %988 = dma.done.wait [#allocation6], 2048  }
  0x36   :  { %989 = vsyncadd [#allocation6], 4294965248  ;;  %v997_v0 = vmov 0.0   ;;  %vm998_vm0 = vmmov 0   ;;  %v872_v1 = vld [vmem:[#allocation2] sm:$0xff]   ;;  %v873_v2 = vld [vmem:[#allocation2 + $0x8] sm:$0xff]  }
  0x37   :  { %789 = vmatprep.subr.bf16.mxu0 %v997_v0  ;;  %805 = vmatprep.mubr.msk.bf16.mxu0 %vm998_vm0, %v997_v0  ;;  %v874_v3 = vld [vmem:[#allocation2 + $0x10] sm:$0xff]   ;;  %v875_v4 = vld [vmem:[#allocation2 + $0x18] sm:$0xff]   ;;  %v876_v5 = vld [vmem:[#allocation2 + $0x20] sm:$0xff]   ;;  %vm203_vm1 = vcmask 130048   ;;  %v999_v36 = vmov 0   ;;  %s1000_s13 = smov [#allocation8]  }
  0x38   :  { %815 = vmatprep.subr.bf16.mxu1 %v997_v0  ;;  %831 = vmatprep.mubr.msk.bf16.mxu1 %vm998_vm0, %v997_v0  ;;  %v877_v6 = vld [vmem:[#allocation2 + $0x28] sm:$0xff]   ;;  %v878_v7 = vld [vmem:[#allocation2 + $0x30] sm:$0xff]   ;;  %v879_v8 = vld [vmem:[#allocation2 + $0x38] sm:$0xff]   ;;  %s712_s4 = sshll.u32 %s1000_s13, 4  ;;  %s713_s4 = int_to_ptr.vmem [resolvable:$true] %s712_s4 }
  0x39   :  { %790 = vmatpush3.bf16.msra.mxu0 %v872_v1  ;;  %v880_v9 = vld [vmem:[%s1194_s1] sm:$0xff]   ;;  %v883_v11 = vld [vmem:[#allocation5 + $0x8] sm:$0xff]   ;;  %v884_v12 = vld [vmem:[#allocation5 + $0x10] sm:$0xff]   ;;  %871 = vset.pattern.permute.xlu1 %v999_v36  ;;  %s964_s10 = scalar_lea.vmem %s713_s4, 128  ;;  %p969_p11 = scmp.lt.s32.totalorder %s713_s4, %s713_s4 }
  0x3a   :  { %791 = vmatprep.subr.bf16.mxu0 %v997_v0  ;;  %v882_v10 = vld [vmem:[#allocation5] sm:$0xff]   ;;  %v885_v13 = vld [vmem:[#allocation5 + $0x18] sm:$0xff]   ;;  %v887_v15 = vld [vmem:[#allocation5 + $0x28] sm:$0xff]   ;;  %870 = vset.pattern.permute.xlu0 %v999_v36  ;;  %p965_p10 = scmp.ne.s32.totalorder %s713_s4, %s964_s10  ;;  %p970_p12 = scmp.lt.s32.totalorder %s964_s10, %s964_s10 }
  0x3b   :  { %816 = vmatpush3.bf16.msra.mxu1 %v882_v10  ;;  %v886_v14 = vld [vmem:[#allocation5 + $0x20] sm:$0xff]   ;;  %v888_v22 = vld [vmem:[#allocation5 + $0x30] sm:$0xff]   ;;  %v889_v23 = vld [vmem:[#allocation5 + $0x38] sm:$0xff]  }
  0x3c   :  { %817 = vmatprep.subr.bf16.mxu1 %v997_v0  ;;  %v1131_v21 = vld [vmem:[%s1193_s0] sm:$0xff]   ;;  %v408_v35 = vld [vmem:[%s1199_s6 + $0x8] sm:$0xff]  ;;  %v892_v60 = vld [vmem:[#allocation7 + $0x10] sm:$0xff]   ;;  %p971_p13 = por %p970_p12, %p969_p11 }
  0x3d   :  { %792 = vmatpush3.bf16.msra.mxu0 %v873_v2  ;;  %v731_v24 = vld [vmem:[%s1196_s3] ss:$0 sm:$0xff]  ;;  %vm431_vm4 = vcmp.eq.s32.totalorder %v408_v35, 1  ;;  %vm410_vm5 = vcmp.eq.s32.totalorder %v408_v35, 0  ;;  %vm452_vm6 = vcmp.eq.s32.totalorder %v408_v35, 2  ;;  %vm473_vm8 = vcmp.eq.s32.totalorder %v408_v35, 3 }
  0x3e   :  { %793 = vmatprep.subr.bf16.mxu0 %v997_v0  ;;  %v407_v34 = vld [vmem:[%s1199_s6] sm:$0xff]  ;;  %v433_v39 = vsel %vm431_vm4, 1, %v999_v36  ;;  %v412_v40 = vsel %vm410_vm5, 1, %v999_v36  ;;  %v454_v41 = vsel %vm452_vm6, 1, %v999_v36  ;;  %v475_v43 = vsel %vm473_vm8, 1, %v999_v36  ;;  %v891_v59 = vld [vmem:[#allocation7 + $0x8] sm:$0xff]   ;;  %p972_p0 = pnand %p971_p13, %p965_p10 }
  0x3f   :  { %818 = vmatpush3.bf16.msra.mxu1 %v883_v11  ;;  %vm430_vm2 = vcmp.eq.s32.totalorder %v407_v34, 1  ;;  %vm409_vm3 = vcmp.eq.s32.totalorder %v407_v34, 0  ;;  %vm451_vm7 = vcmp.eq.s32.totalorder %v407_v34, 2  ;;  %vm472_vm9 = vcmp.eq.s32.totalorder %v407_v34, 3  ;;  %v890_v58 = vld [vmem:[#allocation7] sm:$0xff]   ;;  %v893_v61 = vld [vmem:[#allocation7 + $0x18] sm:$0xff]  }
  0x40   :  { %819 = vmatprep.subr.bf16.mxu1 %v997_v0  ;;  %v432_v37 = vsel %vm430_vm2, 1, %v999_v36  ;;  %v411_v38 = vsel %vm409_vm3, 1, %v999_v36  ;;  %v453_v42 = vsel %vm451_vm7, 1, %v999_v36  ;;  %v474_v44 = vsel %vm472_vm9, 1, %v999_v36  ;;  %v894_v62 = vld [vmem:[#allocation7 + $0x20] sm:$0xff]   ;;  %v895_v63 = vld [vmem:[#allocation7 + $0x28] sm:$0xff]  }
  0x41   :  { %794 = vmatpush3.bf16.msra.mxu0 %v874_v3  ;;  %435 = vperm.xlu1 %871, %v432_v37   ;;  %vm494_vm10 = vcmp.eq.s32.totalorder %v408_v35, 4  ;;  %vm493_vm11 = vcmp.eq.s32.totalorder %v407_v34, 4  ;;  %vm515_vm12 = vcmp.eq.s32.totalorder %v408_v35, 5  ;;  %vm514_vm13 = vcmp.eq.s32.totalorder %v407_v34, 5  ;;  %v896_v1 = vld [vmem:[#allocation7 + $0x30] sm:$0xff]   ;;  %v897_v2 = vld [vmem:[#allocation7 + $0x38] sm:$0xff]  }
  0x42   :  { %795 = vmatprep.subr.bf16.mxu0 %v997_v0  ;;  %414 = vperm.xlu0 %870, %v411_v38   ;;  %v496_v45 = vsel %vm494_vm10, 1, %v999_v36  ;;  %v495_v46 = vsel %vm493_vm11, 1, %v999_v36  ;;  %v517_v47 = vsel %vm515_vm12, 1, %v999_v36  ;;  %v516_v48 = vsel %vm514_vm13, 1, %v999_v36 }
  0x43   :  { %820 = vmatpush3.bf16.msra.mxu1 %v884_v12  ;;  %vm536_vm14 = vcmp.eq.s32.totalorder %v408_v35, 6  ;;  %vm535_vm15 = vcmp.eq.s32.totalorder %v407_v34, 6  ;;  %vm556_vm2 = vcmp.eq.s32.totalorder %v407_v34, 7 }
  0x44   :  { %821 = vmatprep.subr.bf16.mxu1 %v997_v0  ;;  %v538_v49 = vsel %vm536_vm14, 1, %v999_v36  ;;  %v537_v50 = vsel %vm535_vm15, 1, %v999_v36  ;;  %v558_v52 = vsel %vm556_vm2, 1, %v999_v36 }
  0x45   :  { %796 = vmatpush3.bf16.msra.mxu0 %v875_v4  ;;  %438 = vperm.xlu1 %871, %v433_v39  }
  0x46   :  { %797 = vmatprep.subr.bf16.mxu0 %v997_v0  ;;  %417 = vperm.xlu0 %870, %v412_v40  }
  0x47   :  { %822 = vmatpush3.bf16.msra.mxu1 %v885_v13 }
  0x48   :  { %823 = vmatprep.subr.bf16.mxu1 %v997_v0 }
  0x49   :  { %798 = vmatpush3.bf16.msra.mxu0 %v876_v5  ;;  %459 = vperm.xlu1 %871, %v454_v41  }
  0x4a   :  { %799 = vmatprep.subr.bf16.mxu0 %v997_v0  ;;  %456 = vperm.xlu0 %870, %v453_v42  }
  0x4b   :  { %824 = vmatpush3.bf16.msra.mxu1 %v886_v14 }
  0x4c   :  { %825 = vmatprep.subr.bf16.mxu1 %v997_v0 }
  0x4d   :  { %800 = vmatpush3.bf16.msra.mxu0 %v877_v6  ;;  %480 = vperm.xlu1 %871, %v475_v43  }
  0x4e   :  { %801 = vmatprep.subr.bf16.mxu0 %v997_v0  ;;  %477 = vperm.xlu0 %870, %v474_v44  }
  0x4f   :  { %826 = vmatpush3.bf16.msra.mxu1 %v887_v15 }
  0x50   :  { %827 = vmatprep.subr.bf16.mxu1 %v997_v0 }
  0x51   :  { %802 = vmatpush3.bf16.msra.mxu0 %v878_v7  ;;  %501 = vperm.xlu1 %871, %v496_v45  }
  0x52   :  { %803 = vmatprep.subr.bf16.mxu0 %v997_v0  ;;  %498 = vperm.xlu0 %870, %v495_v46  }
  0x53   :  { %828 = vmatpush3.bf16.msra.mxu1 %v888_v22 }
  0x54   :  { %829 = vmatprep.subr.bf16.mxu1 %v997_v0 }
  0x55   :  { %804 = vmatpush3.bf16.msra.mxu0 %v879_v8  ;;  %522 = vperm.xlu1 %871, %v517_v47  }
  0x56   :  { %809 = vmatprep.subr.bf16.mxu0 %v997_v0  ;;  %519 = vperm.xlu0 %870, %v516_v48  }
  0x57   :  { %830 = vmatpush3.bf16.msra.mxu1 %v889_v23 }
  0x58   :  { %806 = vmatmul.mubr.bf16.vlgmr.msra.gmra.mrb[0].mxu0 %v880_v9  ;;  %841 = vmatprep.subr.bf16.mxu1 %v997_v0 }
  0x59   :  { %811 = vmatprep.mubr.msk.bf16.mxu0 %vm998_vm0, %v997_v0  ;;  %543 = vperm.xlu1 %871, %v538_v49  }
  0x5a   :  { %540 = vperm.xlu0 %870, %v537_v50  }
  0x5e   :  { %561 = vperm.xlu0 %870, %v558_v52  }
  0xc0   :  { %v436_v3 = vpop.permute.xlu1 %435 }
  0xc1   :  { %v415_v4 = vpop.permute.xlu0 %414 }
  0xc2   :  { %vm419_vm3 = vcmp.eq.s32.totalorder %v415_v4, 1 }
  0xc4   :  { %v439_v5 = vpop.permute.xlu1 %438 }
  0xc5   :  { %v418_v6 = vpop.permute.xlu0 %417  ;;  %vm441_vm4 = vcmp.eq.s32.totalorder %v439_v5, 1 }
  0xc6   :  { %vm420_vm5 = vcmp.eq.s32.totalorder %v418_v6, 1 }
  0xc8   :  { %v460_v7 = vpop.permute.xlu1 %459 }
  0xc9   :  { %v457_v8 = vpop.permute.xlu0 %456  ;;  %vm462_vm6 = vcmp.eq.s32.totalorder %v460_v7, 1 }
  0xca   :  { %vm461_vm7 = vcmp.eq.s32.totalorder %v457_v8, 1 }
  0xcc   :  { %v481_v9 = vpop.permute.xlu1 %480 }
  0xcd   :  { %v478_v10 = vpop.permute.xlu0 %477  ;;  %vm483_vm8 = vcmp.eq.s32.totalorder %v481_v9, 1 }
  0xce   :  { %vm482_vm9 = vcmp.eq.s32.totalorder %v478_v10, 1 }
  0xd0   :  { %v502_v11 = vpop.permute.xlu1 %501 }
  0xd1   :  { %v499_v12 = vpop.permute.xlu0 %498  ;;  %vm504_vm10 = vcmp.eq.s32.totalorder %v502_v11, 1 }
  0xd2   :  { %vm503_vm11 = vcmp.eq.s32.totalorder %v499_v12, 1 }
  0xd4   :  { %v523_v13 = vpop.permute.xlu1 %522 }
  0xd5   :  { %v520_v14 = vpop.permute.xlu0 %519  ;;  %vm525_vm12 = vcmp.eq.s32.totalorder %v523_v13, 1 }
  0xd6   :  { %vm524_vm13 = vcmp.eq.s32.totalorder %v520_v14, 1 }
  0xd8   :  { %v544_v15 = vpop.permute.xlu1 %543 }
  0xd9   :  { %vm546_vm14 = vcmp.eq.s32.totalorder %v544_v15, 1 }
 0x12b   :  { %v181_v16 = vpop.f32.mrb[0].mxu0 }
 0x12c   :  { %v807_v17 = vpop.f32.mrb[1].mxu0 }
 0x12d   :  { %v184_v18 = vpop.f32.mrb[2].mxu0  ;;  %v742_v17 = vld [vmem:[%s1198_s5] ss:$0 sm:$0xff] }
 0x12e   :  { %v190_v19 = vpack.c.bf16 %v184_v18, %v181_v16  ;;  %v808_v20 = vpop.f32.mrb[3].mxu0  ;;  %v541_v16 = vpop.permute.xlu0 %540 }
 0x12f   :  { %vm545_vm15 = vcmp.eq.s32.totalorder %v541_v16, 1 }
 0x130   :  { %810 = vmatpush3.bf16.msra.mxu0 %v190_v19 }
 0x131   :  { %835 = vmatprep.subr.bf16.mxu0 %v997_v0 }
 0x132   :  { %v562_v19 = vpop.permute.xlu0 %561 }
 0x133   :  { %812 = vmatmul.mubr.msk.bf16.vlgmr.msra.gmra.mrb[4].mxu0 %vm203_vm1, %v1131_v21  ;;  %vm566_vm2 = vcmp.eq.s32.totalorder %v562_v19, 1 }
 0x134   :  { %837 = vmatprep.mubr.msk.bf16.mxu0 %vm998_vm0, %v997_v0 }
 0x206   :  { %v241_v25 = vpop.f32.mrb[4].mxu0 }
 0x207   :  { %v242_v26 = vadd.f32 %v731_v24, %v241_v25  ;;  %v813_v27 = vpop.f32.mrb[5].mxu0 }
 0x208   :  { %v244_v28 = vpop.f32.mrb[6].mxu0 }
 0x209   :  { %v245_v29 = vadd.f32 %v731_v24, %v244_v28  ;;  %v814_v30 = vpop.f32.mrb[7].mxu0  ;;  %v248_v31 = vmax.f32 %v242_v26, 0.0 }
 0x20b   :  { %v249_v32 = vmax.f32 %v245_v29, 0.0 }
 0x20d   :  { %v250_v33 = vpack.c.bf16 %v249_v32, %v248_v31 }
 0x20f   :  { %832 = vmatmul.mubr.bf16.vlgmr.msra.gmra.mrb[0].mxu1 %v250_v33 }
 0x210   :  { %857 = vmatprep.mubr.msk.bf16.mxu1 %vm998_vm0, %v997_v0  ;;  %vm557_vm0 = vcmp.eq.s32.totalorder %v408_v35, 7  ;;  %842 = vmatpush3.bf16.msra.mxu1 %v890_v58 }
 0x211   :  { %v559_v51 = vsel %vm557_vm0, 1, %v999_v36  ;;  %843 = vmatprep.subr.bf16.mxu1 %v997_v0 }
 0x212   :  { %564 = vperm.xlu1 %871, %v559_v51  }
 0x214   :  { %844 = vmatpush3.bf16.msra.mxu1 %v891_v59 }
 0x215   :  { %845 = vmatprep.subr.bf16.mxu1 %v997_v0 }
 0x218   :  { %846 = vmatpush3.bf16.msra.mxu1 %v892_v60 }
 0x219   :  { %847 = vmatprep.subr.bf16.mxu1 %v997_v0 }
 0x21c   :  { %848 = vmatpush3.bf16.msra.mxu1 %v893_v61 }
 0x21d   :  { %849 = vmatprep.subr.bf16.mxu1 %v997_v0 }
 0x220   :  { %850 = vmatpush3.bf16.msra.mxu1 %v894_v62 }
 0x221   :  { %851 = vmatprep.subr.bf16.mxu1 %v997_v0 }
 0x224   :  { %852 = vmatpush3.bf16.msra.mxu1 %v895_v63 }
 0x225   :  { %853 = vmatprep.subr.bf16.mxu1 %v997_v0 }
 0x228   :  { %854 = vmatpush3.bf16.msra.mxu1 %v896_v1 }
 0x229   :  { %855 = vmatprep.subr.bf16.mxu1 %v997_v0 }
 0x22c   :  { %856 = vmatpush3.bf16.msra.mxu1 %v897_v2 }
 0x291   :  { %v565_v0 = vpop.permute.xlu1 %564 }
 0x292   :  { %vm567_vm0 = vcmp.eq.s32.totalorder %v565_v0, 1 }
 0x2e2   :  { %v349_v53 = vpop.f32.mrb[0].mxu1 }
 0x2e3   :  { %v833_v54 = vpop.f32.mrb[1].mxu1 }
 0x2e4   :  { %v352_v55 = vpop.f32.mrb[2].mxu1 }
 0x2e5   :  { %v356_v56 = vpack.c.bf16 %v352_v55, %v349_v53  ;;  %v834_v57 = vpop.f32.mrb[3].mxu1 }
 0x2e7   :  { %836 = vmatpush3.bf16.msra.mxu0 %v356_v56 }
 0x2ea   :  { %838 = vmatmul.mubr.msk.bf16.vlgmr.msra.gmra.mrb[8].mxu0 %vm203_vm1, %v1131_v21  ;;  %vm440_vm1 = vcmp.eq.s32.totalorder %v436_v3, 1 }
 0x3bd   :  { %v398_v18 = vpop.f32.mrb[8].mxu0 }
 0x3be   :  { %v399_v20 = vadd.f32 %v742_v17, %v398_v18  ;;  %v839_v21 = vpop.f32.mrb[9].mxu0 }
 0x3bf   :  { %v401_v22 = vpop.f32.mrb[10].mxu0 }
 0x3c0   :  { %v405_v23 = vmax.f32 %v399_v20, 0.0  ;;  %v402_v24 = vadd.f32 %v742_v17, %v401_v22  ;;  %v840_v25 = vpop.f32.mrb[11].mxu0 }
 0x3c2   :  { %v406_v26 = vmax.f32 %v402_v24, 0.0  ;;  %v421_v27 = vsel %vm419_vm3, %v405_v23, -inf  ;;  %v442_v28 = vsel %vm440_vm1, %v405_v23, -inf  ;;  %v463_v29 = vsel %vm461_vm7, %v405_v23, -inf }
 0x3c3   :  { %v484_v30 = vsel %vm482_vm9, %v405_v23, -inf  ;;  %v505_v31 = vsel %vm503_vm11, %v405_v23, -inf  ;;  %v526_v32 = vsel %vm524_vm13, %v405_v23, -inf  ;;  %v547_v33 = vsel %vm545_vm15, %v405_v23, -inf }
 0x3c4   :  { %v422_v34 = vsel %vm420_vm5, %v406_v26, -inf  ;;  %v443_v35 = vsel %vm441_vm4, %v406_v26, -inf  ;;  %v464_v36 = vsel %vm462_vm6, %v406_v26, -inf  ;;  %v485_v37 = vsel %vm483_vm8, %v406_v26, -inf }
 0x3c5   :  { %v423_v38 = vmax.f32 %v421_v27, %v422_v34  ;;  %v444_v39 = vmax.f32 %v442_v28, %v443_v35  ;;  %v465_v40 = vmax.f32 %v463_v29, %v464_v36  ;;  %v486_v41 = vmax.f32 %v484_v30, %v485_v37 }
 0x3c6   :  { %v506_v42 = vsel %vm504_vm10, %v406_v26, -inf  ;;  %v527_v43 = vsel %vm525_vm12, %v406_v26, -inf  ;;  %v548_v44 = vsel %vm546_vm14, %v406_v26, -inf  ;;  %v568_v45 = vsel %vm566_vm2, %v405_v23, -inf }
 0x3c7   :  { %v424_v46 = vrot.slane %v423_v38, 4  ;;  %v445_v47 = vrot.slane %v444_v39, 4  ;;  %v466_v48 = vrot.slane %v465_v40, 4  ;;  %v487_v49 = vrot.slane %v486_v41, 4 }
 0x3c8   :  { %v507_v50 = vmax.f32 %v505_v31, %v506_v42  ;;  %v528_v51 = vmax.f32 %v526_v32, %v527_v43  ;;  %v549_v52 = vmax.f32 %v547_v33, %v548_v44  ;;  %v569_v53 = vsel %vm567_vm0, %v406_v26, -inf  ;;  %v744_v43 = vld [vmem:[%s1201_s8] ss:$0 sm:$0xff] }
 0x3c9   :  { %vm577_vm1 = vcmask 1040384   ;;  %v425_v54 = vmax.f32 %v423_v38, %v424_v46  ;;  %v446_v55 = vmax.f32 %v444_v39, %v445_v47  ;;  %v467_v56 = vmax.f32 %v465_v40, %v466_v48 }
 0x3ca   :  { %v488_v57 = vmax.f32 %v486_v41, %v487_v49  ;;  %v508_v58 = vrot.slane %v507_v50, 4  ;;  %v529_v59 = vrot.slane %v528_v51, 4  ;;  %v550_v60 = vrot.slane %v549_v52, 4 }
 0x3cb   :  { %v570_v61 = vmax.f32 %v568_v45, %v569_v53  ;;  %v426_v62 = vrot.slane %v425_v54, 2  ;;  %v447_v63 = vrot.slane %v446_v55, 2  ;;  %v468_v1 = vrot.slane %v467_v56, 2 }
 0x3cc   :  { %v489_v2 = vrot.slane %v488_v57, 2  ;;  %v509_v3 = vmax.f32 %v507_v50, %v508_v58  ;;  %v530_v4 = vmax.f32 %v528_v51, %v529_v59  ;;  %v551_v5 = vmax.f32 %v549_v52, %v550_v60 }
 0x3cd   :  { %v571_v6 = vrot.slane %v570_v61, 4  ;;  %v427_v7 = vmax.f32 %v425_v54, %v426_v62  ;;  %v448_v8 = vmax.f32 %v446_v55, %v447_v63  ;;  %v469_v9 = vmax.f32 %v467_v56, %v468_v1 }
 0x3ce   :  { %v490_v10 = vmax.f32 %v488_v57, %v489_v2  ;;  %v510_v11 = vrot.slane %v509_v3, 2  ;;  %v531_v12 = vrot.slane %v530_v4, 2  ;;  %v552_v13 = vrot.slane %v551_v5, 2 }
 0x3cf   :  { %v572_v14 = vmax.f32 %v570_v61, %v571_v6  ;;  %v428_v15 = vrot.slane %v427_v7, 1  ;;  %v449_v16 = vrot.slane %v448_v8, 1  ;;  %v470_v17 = vrot.slane %v469_v9, 1 }
 0x3d0   :  { %v491_v0 = vrot.slane %v490_v10, 1  ;;  %v511_v18 = vmax.f32 %v509_v3, %v510_v11  ;;  %v532_v19 = vmax.f32 %v530_v4, %v531_v12  ;;  %v553_v20 = vmax.f32 %v551_v5, %v552_v13 }
 0x3d1   :  { %v573_v21 = vrot.slane %v572_v14, 2  ;;  %v429_v22 = vmax.f32 %v427_v7, %v428_v15  ;;  %v450_v23 = vmax.f32 %v448_v8, %v449_v16  ;;  %v471_v24 = vmax.f32 %v469_v9, %v470_v17 }
 0x3d2   :  { %v512_v25 = vrot.slane %v511_v18, 1  ;;  %v533_v26 = vrot.slane %v532_v19, 1  ;;  %vm579_vm3 = vcmask 1041408   ;;  %v554_v28 = vrot.slane %v553_v20, 1 }
 0x3d3   :  { %v574_v27 = vmax.f32 %v572_v14, %v573_v21  ;;  %v578_v29 = vsel %vm577_vm1, %v429_v22, %v450_v23  ;;  %vm581_vm4 = vcmask 1042432   ;;  %v492_v30 = vmax.f32 %v490_v10, %v491_v0 }
 0x3d4   :  { %vm583_vm5 = vcmask 1043456   ;;  %v513_v32 = vmax.f32 %v511_v18, %v512_v25  ;;  %v580_v33 = vsel %vm579_vm3, %v578_v29, %v471_v24  ;;  %vm585_vm6 = vcmask 1044480  }
 0x3d5   :  { %v575_v31 = vrot.slane %v574_v27, 1  ;;  %v534_v34 = vmax.f32 %v532_v19, %v533_v26  ;;  %v582_v35 = vsel %vm581_vm4, %v580_v33, %v492_v30  ;;  %vm587_vm7 = vcmask 1045504  }
 0x3d6   :  { %v555_v36 = vmax.f32 %v553_v20, %v554_v28  ;;  %v584_v37 = vsel %vm583_vm5, %v582_v35, %v513_v32  ;;  %vm589_vm8 = vcmask 1046528  }
 0x3d7   :  { %v576_v38 = vmax.f32 %v574_v27, %v575_v31  ;;  %v586_v39 = vsel %vm585_vm6, %v584_v37, %v534_v34 }
 0x3d8   :  { %v588_v40 = vsel %vm587_vm7, %v586_v39, %v555_v36 }
 0x3d9   :  { %v590_v41 = vsel %vm589_vm8, %v588_v40, %v576_v38 }
 0x3da   :  { %vm591_vm9 = vcmp.eq.f32.partialorder %v590_v41, -inf  ;;  %v756_v42 = vpack.c.bf16 %v590_v41, %v590_v41 }
 0x3db   :  { %vm753_vm10 = vmneg %vm591_vm9 }
 0x3dc   :  { %vm755_vm11 = vmpackc.low %vm753_vm10, %vm753_vm10 }
 0x3dd   :  { %858 = vmatmul.mubr.msk.bf16.vlgmr.msra.gmra.mrb[4].mxu1 %vm755_vm11, %v756_v42 }
 0x4b0   :  { %v699_v44 = vpop.f32.mrb[4].mxu1 }
 0x4b1   :  { %v700_v45 = vadd.f32 %v744_v43, %v699_v44  ;;  %v859_v46 = vpop.f32.mrb[5].mxu1 }
 0x4b2   :  { %v702_v47 = vpop.f32.mrb[6].mxu1 }
 0x4b3   :  { %705 = vst [vmem:[#allocation8] sm:$0xff] %v700_v45  ;;  %v860_v48 = vpop.f32.mrb[7].mxu1 }
 0x4b4   :  { %975 = shalt.err (!%p972_p0)
}
 0x4b5   :  { %s976_s8 = scalar_lea.hbm %s1202_s9, 128 }
 0x4b6   :  { %p977_p1 = scmp.ne.s32.totalorder %s1202_s9, %s976_s8  ;;  %p980_p2 = scmp.lt.u32.totalorder %s976_s8, %s1202_s9 }
 0x4b8   :  { %p982_p3 = pnand %p980_p2, %p977_p1 }
 0x4ba   :  { %985 = shalt.err (!%p982_p3)
}
 0x4bb   :  { %715 = dma.vmem_to_hbm [thread:$0]  %s713_s4, 128, %s1202_s9, [#allocation4]  }
 0x4bc   :  { %990 = dma.done.wait [#allocation4], 128  }
 0x4bd   :  { %991 = vsyncadd [#allocation4], 4294967168 }
 0x4be   :  { %719 = vsyncpa [#allocation3], 1 }
 0x4bf   :  { %720 = vsyncpa [#allocation6], 1 }
 0x4c0   :  { %721 = vsyncpa [#allocation4], 1 }

</bundles_post_ra>
